<compile_context>
chip_gen: v7x
topology: tpu7x:2x2x1
jax: 0.10.0
libtpu: 0.0.40
codegen_flags: <defaults>
</compile_context>

<pallas_src>
import jax
import jax.numpy as jnp
from jax.experimental import pallas as pl
from jax.experimental.pallas import tpu as pltpu

LANE = 128


def _sum_kernel(*refs):
    """refs = (x_0, ..., x_{n-1}, o).  Plain unweighted sum, f32 accumulation."""
    o_ref = refs[-1]
    xs = refs[:-1]
    acc = xs[0][...].astype(jnp.float32)
    for x in xs[1:]:
        acc = acc + x[...].astype(jnp.float32)
    o_ref[...] = acc.astype(o_ref.dtype)


def _weighted_sum_kernel(w_ref, *refs):
    """w_ref: SMEM (n-1,) f32 = 2*sigmoid(w)  (scalar-prefetched).
       refs  = (x_0, ..., x_{n-1}, o);  y = x0 + sum_i x_{i+1} * w[i]."""
    o_ref = refs[-1]
    xs = refs[:-1]
    acc = xs[0][...].astype(jnp.float32)
    for i in range(1, len(xs)):
        acc = acc + xs[i][...].astype(jnp.float32) * w_ref[i - 1]
    o_ref[...] = acc.astype(o_ref.dtype)


def pallas_sum(xs, w=None, *, max_rows=2048):
    """Pallas implementation of Sum.forward.

    xs: list of n arrays with identical shape/dtype.
    w : None (weight=False) or the (n-1,) learnable parameter (weight=True).
    """
    n = len(xs)
    shape = xs[0].shape
    dtype = xs[0].dtype
    total = int(xs[0].size)

    if n == 1:
        return xs[0]

    itemsize = jnp.dtype(dtype).itemsize
    sub = max(8, 32 // itemsize)            # sublane tile: 8 f32 / 16 bf16 / 32 int8

    # ---- lane-dense (R, 128) view of every input -----------------------------
    # Free bitcast when total % 128 == 0; only the ragged-tail case pads.
    lane_pad = (-total) % LANE
    R = (total + lane_pad) // LANE

    def as_rows(x):
        fx = jnp.ravel(x)
        if lane_pad:
            fx = jnp.pad(fx, (0, lane_pad))  # zeros: safe for a sum
        return fx.reshape(R, LANE)

    rows = [as_rows(x) for x in xs]

    # ---- row-tile selection --------------------------------------------------
    #  * multiple of the dtype's packed sublane tile,
    #  * fits a double-buffered VMEM budget for n inputs + 1 output,
    #  * >= 2 grid blocks when possible (megacore on v7x),
    #  * equal to the full row extent when everything fits in one block.
    vmem_budget = 20 * 1024 * 1024           # under the explicit 32 MiB limit below
    tr_budget = max(sub, (vmem_budget // (2 * (n + 1) * LANE * itemsize)) // sub * sub)
    tr_half = pl.cdiv(pl.cdiv(R, 2), sub) * sub
    TR = max(sub, min(max_rows, tr_budget, tr_half))
    if TR >= R:
        TR = R                               # block dim == full array dim (allowed)
    nblk = pl.cdiv(R, TR)

    out_shape2d = jax.ShapeDtypeStruct((R, LANE), dtype)
    cparams = pltpu.CompilerParams(
        dimension_semantics=("parallel",),   # independent output blocks
        vmem_limit_bytes=32 * 1024 * 1024)   # valid on v5e / v6e / v7x

    if w is None:
        out2d = pl.pallas_call(
            _sum_kernel,
            out_shape=out_shape2d,
            grid_spec=pltpu.PrefetchScalarGridSpec(
                num_scalar_prefetch=0,
                grid=(nblk,),
                in_specs=[pl.BlockSpec((TR, LANE), lambda r: (r, 0))
                          for _ in range(n)],
                out_specs=pl.BlockSpec((TR, LANE), lambda r: (r, 0)),
            ),
            compiler_params=cparams,
        )(*rows)
    else:
        weights = (2.0 * jax.nn.sigmoid(w.astype(jnp.float32))).astype(jnp.float32)
        out2d = pl.pallas_call(
            _weighted_sum_kernel,
            out_shape=out_shape2d,
            grid_spec=pltpu.PrefetchScalarGridSpec(
                num_scalar_prefetch=1,       # (n-1,) weights -> SMEM
                grid=(nblk,),
                in_specs=[pl.BlockSpec((TR, LANE), lambda r, ws: (r, 0))
                          for _ in range(n)],
                out_specs=pl.BlockSpec((TR, LANE), lambda r, ws: (r, 0)),
            ),
            compiler_params=cparams,
        )(weights, *rows)

    flat = out2d.reshape(-1)
    if lane_pad:
        flat = flat[:total]
    return flat.reshape(shape)


def reference_sum(xs, w=None):
    """Pure-JAX reference mirroring the PyTorch module (f32 accumulation)."""
    y = xs[0].astype(jnp.float32)
    if w is not None:
        ww = jax.nn.sigmoid(w.astype(jnp.float32)) * 2.0
        for i in range(len(xs) - 1):
            y = y + xs[i + 1].astype(jnp.float32) * ww[i]
    else:
        for i in range(len(xs) - 1):
            y = y + xs[i + 1].astype(jnp.float32)
    return y


if __name__ == "__main__":
    key = jax.random.PRNGKey(0)
    ks = jax.random.split(key, 16)

    # -------- case 1: n=3, (2,4,16,16) f32, unweighted & weighted -------------
    n = 3
    shape = (2, 4, 16, 16)
    xs = [jax.random.normal(ks[i], shape, jnp.float32) for i in range(n)]
    w_param = (-(jnp.arange(1.0, n)) / 2.0).astype(jnp.float32)   # module init

    y0 = jax.block_until_ready(pallas_sum(xs))
    err0 = float(jnp.max(jnp.abs(y0.astype(jnp.float32) - reference_sum(xs))))
    assert y0.shape == shape and err0 < 1e-5, f"case1 unweighted: {err0}"

    y1 = jax.block_until_ready(pallas_sum(xs, w_param))
    err1 = float(jnp.max(jnp.abs(y1.astype(jnp.float32) - reference_sum(xs, w_param))))
    assert y1.shape == shape and err1 < 1e-5, f"case1 weighted: {err1}"

    # -------- case 2: n=4, ragged (2,3,7,5) f32 (exercises lane padding) ------
    n2 = 4
    shape2 = (2, 3, 7, 5)
    xs2 = [jax.random.normal(ks[3 + i], shape2, jnp.float32) for i in range(n2)]
    w2 = (-(jnp.arange(1.0, n2)) / 2.0).astype(jnp.float32)

    y2 = jax.block_until_ready(pallas_sum(xs2))
    err2 = float(jnp.max(jnp.abs(y2.astype(jnp.float32) - reference_sum(xs2))))
    assert y2.shape == shape2 and err2 < 1e-5, f"case2 unweighted: {err2}"

    y3 = jax.block_until_ready(pallas_sum(xs2, w2))
    err3 = float(jnp.max(jnp.abs(y3.astype(jnp.float32) - reference_sum(xs2, w2))))
    assert y3.shape == shape2 and err3 < 1e-5, f"case2 weighted: {err3}"

    # -------- case 3: n=2, (20,128) f32 weighted (uneven boundary block) ------
    n3 = 2
    shape3 = (20, 128)
    xs3 = [jax.random.normal(ks[8 + i], shape3, jnp.float32) for i in range(n3)]
    w3 = (-(jnp.arange(1.0, n3)) / 2.0).astype(jnp.float32)

    y4 = jax.block_until_ready(pallas_sum(xs3, w3))
    err4 = float(jnp.max(jnp.abs(y4.astype(jnp.float32) - reference_sum(xs3, w3))))
    assert y4.shape == shape3 and err4 < 1e-5, f"case3 weighted: {err4}"

    # -------- case 4: n=3, (2,4,16,16) bf16 weighted (packed sublane path) ----
    xsb = [x.astype(jnp.bfloat16) for x in xs]
    y5 = jax.block_until_ready(pallas_sum(xsb, w_param))
    err5 = float(jnp.max(jnp.abs(y5.astype(jnp.float32) - reference_sum(xsb, w_param))))
    assert y5.shape == shape and err5 < 1e-1, f"case4 bf16 weighted: {err5}"

    print("KERNEL_OK")
</pallas_src>

<mosaic_0001>
module attributes {stable_mosaic.version = 11 : i64} {
  func.func @_sum_kernel(%arg0: i32, %arg1: memref<8x128xf32, #tpu.memory_space<vmem>>, %arg2: memref<8x128xf32, #tpu.memory_space<vmem>>, %arg3: memref<8x128xf32, #tpu.memory_space<vmem>>, %arg4: memref<8x128xf32, #tpu.memory_space<vmem>>) attributes {dimension_semantics = [#tpu.dimension_semantics<parallel>], iteration_bounds = array<i64: 2>, scalar_prefetch = 0 : i64, scratch_operands = 0 : i64, tpu.core_type = #tpu.core_type<tc>, window_params = [{transform_indices = @transform_0, window_bounds = array<i64: 8, 128>}, {transform_indices = @transform_1, window_bounds = array<i64: 8, 128>}, {transform_indices = @transform_2, window_bounds = array<i64: 8, 128>}, {transform_indices = @transform_3, window_bounds = array<i64: 8, 128>}]} {
    %c0 = arith.constant 0 : index
    %c0_0 = arith.constant 0 : index
    %0 = vector.load %arg1[%c0, %c0_0] : memref<8x128xf32, #tpu.memory_space<vmem>>, vector<8x128xf32>
    %c0_1 = arith.constant 0 : index
    %c0_2 = arith.constant 0 : index
    %1 = vector.load %arg2[%c0_1, %c0_2] : memref<8x128xf32, #tpu.memory_space<vmem>>, vector<8x128xf32>
    %2 = arith.addf %0, %1 : vector<8x128xf32>
    %c0_3 = arith.constant 0 : index
    %c0_4 = arith.constant 0 : index
    %3 = vector.load %arg3[%c0_3, %c0_4] : memref<8x128xf32, #tpu.memory_space<vmem>>, vector<8x128xf32>
    %4 = arith.addf %2, %3 : vector<8x128xf32>
    %c0_5 = arith.constant 0 : index
    %c0_6 = arith.constant 0 : index
    %5 = vector.load %arg4[%c0_5, %c0_6] : memref<8x128xf32, #tpu.memory_space<vmem>>, vector<8x128xf32>
    tpu.vector_store %arg4[%c0_5, %c0_6], %4 {strides = array<i32>} : memref<8x128xf32, #tpu.memory_space<vmem>>, vector<8x128xf32>,
    return
  }
  func.func @transform_0(%arg0: i32) -> (i32, i32) {
    %c0_i32 = arith.constant 0 : i32
    %c0_i32_0 = arith.constant 0 : i32
    return %arg0, %c0_i32 : i32, i32
  }
  func.func @transform_1(%arg0: i32) -> (i32, i32) {
    %c0_i32 = arith.constant 0 : i32
    %c0_i32_0 = arith.constant 0 : i32
    return %arg0, %c0_i32 : i32, i32
  }
  func.func @transform_2(%arg0: i32) -> (i32, i32) {
    %c0_i32 = arith.constant 0 : i32
    %c0_i32_0 = arith.constant 0 : i32
    return %arg0, %c0_i32 : i32, i32
  }
  func.func @transform_3(%arg0: i32) -> (i32, i32) {
    %c0_i32 = arith.constant 0 : i32
    %c0_i32_0 = arith.constant 0 : i32
    return %arg0, %c0_i32 : i32, i32
  }
}

</mosaic_0001>

<bundles_post_ra>
// kernel: tpu_custom_call.1
= control target key start
LH: loop header
LB: loop body
LE: loop exit
PB: predicated region body
PF: predicated region fallthrough
CT: control target
= control target key end

     0   :  { %s879_s0 = inlined_call_operand.hbm [shape: f32[16,128], index: 0, kind: input, shape index: {}]   ;;  %s880_s1 = inlined_call_operand.hbm [shape: f32[16,128], index: 1, kind: input, shape index: {}]   ;;  %s881_s2 = inlined_call_operand.hbm [shape: f32[16,128], index: 2, kind: input, shape index: {}]   ;;  %s882_s3 = inlined_call_operand.hbm [shape: f32[16,128], index: 3, kind: output, shape index: {}]  }
   0x1   :  { %887 = sst [smem:[#allocation12_spill]] %s880_s1 }
   0x2   :  { %8 = vsyncpa [#allocation3], 0 }
   0x3   :  { %10 = vsyncpa [#allocation3 + $0x1], 0 }
   0x4   :  { %11 = vsyncpa [#allocation6], 0 }
   0x5   :  { %13 = vsyncpa [#allocation6 + $0x1], 0 }
   0x6   :  { %14 = vsyncpa [#allocation4], 0 }
   0x7   :  { %16 = vsyncpa [#allocation4 + $0x1], 0  ;;  %s650_s12 = smov 0   ;;  %s652_s13 = smov 0  }
   0x8   :  { %s654_s14 = smov 0   ;;  %s656_s15 = smov 0  }
   0x9 LB: > { %s671_s16 = sadd.s32 4294967295, %s624_s15   ;;  %s390_s17 = sadd.s32 4294967294, %s624_s15   ;;  %s624_s15 = sphi %s656_s15, %s906_s15   ;;  %s620_s14 = sphi %s654_s14, %s905_s14   ;;  %s616_s13 = sphi %s652_s13, %s904_s13   ;;  %s612_s12 = sphi %s650_s12, %s903_s12  }
   0xa   : > { %s675_s18 = sadd.s32 1, %s624_s15   ;;  %s29_s19 = sadd.s32 1, %s620_s14 }
   0xb   : > { %s26_s20 = ssub.s32 %s624_s15, %s675_s18  ;;  %p36_p0 = scmp.ne.s32.totalorder %s620_s14, %s616_s13 }
   0xc   : > { %p27_p1 = scmp.eq.s32.totalorder %s26_s20, 0  ;;  %p37_p2 = scmp.eq.s32.totalorder %s624_s15, 0 }
   0xd   : > { %p42_p3 = scmp.ne.s32.totalorder %s616_s13, %s612_s12  ;;  %p43_p4 = scmp.eq.s32.totalorder %s671_s16, 0 }
   0xe   : > { %s687_s21 = scalar_select %p27_p1, %s620_s14, %s29_s19  }
   0xf   : > { %p38_p5 = por %p37_p2, %p36_p0  ;;  %p689_p6 = por %p43_p4, %p42_p3 }
  0x10   : > { %p118_p7 = scmp.eq.s32.totalorder %s671_s16, 1  ;;  %p124_p8 = scmp.eq.s32.totalorder %s390_s17, 1 }
  0x11   : > { %s888_s22 = scalar_select %p689_p6, 1, 0 }
  0x12   : > { %p430_p10 = scmp.lt.s32.totalorder %s624_s15, 2  ;;  %p696_p11 = por %p118_p7, %p36_p0 }
  0x13   : > { %p700_p12 = por %p124_p8, %p42_p3  ;;  %s144_s25 = sand.u32 1, %s620_s14  }
  0x14   : > { %s889_s23 = scalar_select %p696_p11, 1, 0 }
  0x15   : > { %s890_s24 = scalar_select %p700_p12, 1, 0 }
  0x16   : > { %s706_s26 = sshll.u32 %s624_s15, 7  ;;  %s710_s27 = sshll.u32 %s144_s25, 3 }
  0x17   : > { %p712_p13 = pnand %p430_p10, %p38_p5  ;;  %s162_s29 = sand.u32 1, %s624_s15  }
  0x18   : > { %s892_s1 = sld [smem:[#allocation12_spill]]  ;;  %s166_s6 = scalar_lea.vmem [#allocation5], %s710_s27 }
  0x19   : > { %s891_s28 = scalar_select %p712_p13, 1, 0 }
  0x1a   : > { %s173_s7 = sshll.u32 %s166_s6, 4  ;;  %s727_s8 = scalar_lea.sflag [#allocation6], %s162_s29  ;;  %s724_s7 = int_to_ptr.vmem [resolvable:$true] %s173_s7 }
  0x1b   : > { %p733_p2 = pneg %p712_p13 }
  0x1e   : > { %s721_s5 = scalar_lea.hbm %s892_s1, %s706_s26  ;;  %s469_s19 = scalar_lea.hbm %s892_s1, 256 }
  0x1f   : > { %s464_s9 = scalar_lea.hbm %s721_s5, 128  ;;  %p470_p5 = scmp.lt.u32.totalorder %s721_s5, %s892_s1 }
  0x20   : > { %p465_p1 = scmp.ne.s32.totalorder %s721_s5, %s464_s9  ;;  %p471_p7 = scmp.lt.u32.totalorder %s469_s19, %s464_s9 }
  0x21   : > { %p473_p10 = scmp.lt.u32.totalorder %s464_s9, %s721_s5 }
  0x22   : > { %p467_p3 = pnand %p733_p2, %p465_p1  ;;  %p472_p8 = por %p471_p7, %p470_p5 }
  0x24   : > { %p468_p4 = pneg %p467_p3  ;;  %p474_p9 = por %p473_p10, %p472_p8 }
  0x26   : > { %p475_p0 = pnand %p474_p9, %p468_p4 }
  0x28   : > { %478 = shalt.err (!%p475_p0)
}
  0x29   : > { %s479_s29 = scalar_lea.vmem %s724_s7, 128  ;;  %s626_s4 = smov [#allocation5]  }
  0x2a   : > { %p480_p1 = scmp.ne.s32.totalorder %s724_s7, %s479_s29  ;;  %s484_s6 = sshll.u32 %s626_s4, 4  ;;  %s485_s6 = int_to_ptr.vmem [resolvable:$false] %s484_s6 }
  0x2b   : > { %s486_s11 = scalar_lea.vmem %s485_s6, 256  ;;  %p487_p11 = scmp.lt.s32.totalorder %s724_s7, %s485_s6 }
  0x2c   : > { %p482_p3 = pnand %p480_p1, %p733_p2  ;;  %p488_p6 = scmp.lt.s32.totalorder %s486_s11, %s479_s29 }
  0x2e   : > { %p483_p12 = pneg %p482_p3  ;;  %p489_p5 = por %p488_p6, %p487_p11 }
  0x30   : > { %p490_p7 = pnand %p489_p5, %p483_p12 }
  0x32   : > { %493 = shalt.err (!%p490_p7)
}
  0x33   : > { %422 = dma.hbm_to_vmem [thread:$0]  (!%p712_p13), %s721_s5, 128, %s724_s7, %s727_s8  }
  0x34   : > { %p196_p9 = scmp.lt.s32.totalorder %s624_s15, 3  ;;  %s762_s19 = scalar_lea.hbm %s879_s0, %s706_s26 }
  0x35   : > { %p894_p6 = scmp.ge.s32.totalorder %s624_s15, 1  ;;  %s148_s30 = scalar_lea.vmem [#allocation2], %s710_s27 }
  0x36   : > { %s155_s29 = sshll.u32 %s148_s30, 4  ;;  %s145_s5 = scalar_lea.sflag [#allocation3], %s144_s25  ;;  %s156_s29 = int_to_ptr.vmem [resolvable:$true] %s155_s29 }
  0x37   : > { %p766_p11 = pnand %p894_p6, %p196_p9  ;;  %s494_s7 = scalar_lea.hbm %s762_s19, 128 }
  0x38   : > { %p495_p12 = scmp.ne.s32.totalorder %s762_s19, %s494_s7  ;;  %s499_s11 = scalar_lea.hbm %s879_s0, 256 }
  0x39   : > { %s895_s20 = scalar_select %p766_p11, 1, 0 }
  0x3a   : > { %p497_p0 = pnand %p495_p12, %p733_p2  ;;  %p500_p8 = scmp.lt.u32.totalorder %s762_s19, %s879_s0 }
  0x3b   : > { %p501_p10 = scmp.lt.u32.totalorder %s499_s11, %s494_s7  ;;  %p503_p3 = scmp.lt.u32.totalorder %s494_s7, %s762_s19 }
  0x3c   : > { %p498_p4 = pneg %p497_p0 }
  0x3d   : > { %p502_p1 = por %p501_p10, %p500_p8 }
  0x3f   : > { %p504_p5 = por %p503_p3, %p502_p1 }
  0x41   : > { %p505_p7 = pnand %p504_p5, %p498_p4 }
  0x43   : > { %508 = shalt.err (!%p505_p7)
}
  0x44   : > { %s509_s25 = scalar_lea.vmem %s156_s29, 128  ;;  %s627_s30 = smov [#allocation2]  }
  0x45   : > { %p510_p9 = scmp.ne.s32.totalorder %s156_s29, %s509_s25  ;;  %s514_s1 = sshll.u32 %s627_s30, 4  ;;  %s515_s1 = int_to_ptr.vmem [resolvable:$false] %s514_s1 }
  0x46   : > { %s516_s4 = scalar_lea.vmem %s515_s1, 256  ;;  %p517_p0 = scmp.lt.s32.totalorder %s156_s29, %s515_s1 }
  0x47   : > { %p512_p6 = pnand %p510_p9, %p733_p2  ;;  %p518_p11 = scmp.lt.s32.totalorder %s516_s4, %s509_s25 }
  0x49   : > { %p513_p12 = pneg %p512_p6  ;;  %p519_p13 = por %p518_p11, %p517_p0 }
  0x4b   : > { %p520_p8 = pnand %p519_p13, %p513_p12 }
  0x4d   : > { %523 = shalt.err (!%p520_p8)
}
  0x4e   : > { %p896_p10 = scmp.ne.s32.totalorder %s891_s28, 0  ;;  %s794_s11 = scalar_lea.hbm %s881_s2, %s706_s26 }
  0x4f   : > { %s184_s1 = scalar_lea.vmem [#allocation7], %s710_s27  ;;  %s524_s17 = scalar_lea.hbm %s794_s11, 128 }
  0x50   : > { %419 = dma.hbm_to_vmem [thread:$0]  (!%p896_p10), %s762_s19, 128, %s156_s29, %s145_s5  }
  0x51   : > { %s191_s9 = sshll.u32 %s184_s1, 4  ;;  %p525_p13 = scmp.ne.s32.totalorder %s794_s11, %s524_s17  ;;  %s192_s9 = int_to_ptr.vmem [resolvable:$true] %s191_s9 }
  0x52   : > { %s529_s19 = scalar_lea.hbm %s881_s2, 256  ;;  %p530_p1 = scmp.lt.u32.totalorder %s794_s11, %s881_s2 }
  0x53   : > { %p527_p11 = pnand %p525_p13, %p733_p2  ;;  %p531_p3 = scmp.lt.u32.totalorder %s529_s19, %s524_s17 }
  0x54   : > { %p533_p7 = scmp.lt.u32.totalorder %s524_s17, %s794_s11 }
  0x55   : > { %p528_p4 = pneg %p527_p11  ;;  %p532_p5 = por %p531_p3, %p530_p1 }
  0x57   : > { %p534_p9 = por %p533_p7, %p532_p5 }
  0x59   : > { %p535_p6 = pnand %p534_p9, %p528_p4 }
  0x5b   : > { %538 = shalt.err (!%p535_p6)
}
  0x5c   : > { %s539_s26 = scalar_lea.vmem %s192_s9, 128  ;;  %s628_s27 = smov [#allocation7]  }
  0x5d   : > { %p540_p12 = scmp.ne.s32.totalorder %s192_s9, %s539_s26  ;;  %s544_s4 = sshll.u32 %s628_s27, 4  ;;  %s545_s4 = int_to_ptr.vmem [resolvable:$false] %s544_s4 }
  0x5e   : > { %s546_s7 = scalar_lea.vmem %s545_s4, 256  ;;  %p547_p13 = scmp.lt.s32.totalorder %s192_s9, %s545_s4 }
  0x5f   : > { %p542_p0 = pnand %p540_p12, %p733_p2  ;;  %p548_p11 = scmp.lt.s32.totalorder %s546_s7, %s539_s26 }
  0x61   : > { %p543_p8 = pneg %p542_p0  ;;  %p549_p10 = por %p548_p11, %p547_p13 }
  0x63   : > { %p550_p1 = pnand %p549_p10, %p543_p8 }
  0x65   : > { %553 = shalt.err (!%p550_p1)
}
  0x66   : > { %p897_p3 = scmp.ne.s32.totalorder %s891_s28, 0  ;;  %p898_p4 = scmp.ne.s32.totalorder %s895_s20, 0 }
  0x67   : > { %s818_s10 = sand.u32 (!%p898_p4), 1, %s616_s13   ;;  %p899_p2 = scmp.ne.s32.totalorder (!%p898_p4), %s888_s22, 0 }
  0x68   : > { %425 = dma.hbm_to_vmem [thread:$0]  (!%p897_p3), %s794_s11, 128, %s192_s9, %s727_s8  }
  0x69   : > { %200 = sbr.rel (%p898_p4) target bundleno = 142 (0x8e), region = 32  ;;  %s400_s6 = sshll.u32 (!%p898_p4), %s818_s10, 3 }
  0x6a   : > { %s203_s1 = scalar_lea.sflag (!%p898_p4), [#allocation3], %s818_s10  ;;  %s206_s17 = scalar_lea.vmem (!%p898_p4), [#allocation2], %s400_s6 }
  0x70   : > { %599 = dma.done.wait (%p899_p2), %s203_s1, 128  }
  0x71   : > { %601 = vsyncadd (%p899_p2), %s203_s1, 4294967168  ;;  %s211_s28 = sand.u32 1, %s671_s16   ;;  %s215_s20 = scalar_lea.vmem [#allocation5], %s400_s6 }
  0x72   : > { %s212_s8 = scalar_lea.sflag [#allocation6], %s211_s28 }
  0x73   : > { %603 = dma.done.wait (%p899_p2), %s212_s8, 256  }
  0x74   : > { %605 = vsyncadd (%p899_p2), %s212_s8, 4294967040  ;;  %v257_v0 = vld [vmem:[%s206_s17] sm:$0xff]  ;;  %v258_v1 = vld [vmem:[%s215_s20] sm:$0xff]  ;;  %s224_s11 = scalar_lea.vmem [#allocation7], %s400_s6  ;;  %s256_s9 = scalar_lea.vmem [#allocation8], %s400_s6 }
  0x75   : > { %v260_v2 = vld [vmem:[%s224_s11] sm:$0xff]  ;;  %s277_s25 = sshll.u32 %s256_s9, 4  ;;  %s405_s30 = sshll.u32 %s671_s16, 7  ;;  %v259_v3 = vadd.f32 %v258_v1, %v257_v0  ;;  %s832_s25 = int_to_ptr.vmem [resolvable:$true] %s277_s25 }
  0x76   : > { %s837_s22 = scalar_lea.hbm %s882_s3, %s405_s30  ;;  %s264_s5 = scalar_lea.sflag [#allocation4], %s818_s10 }
  0x77   : > { %v261_v4 = vadd.f32 %v260_v2, %v259_v3  ;;  %s554_s26 = scalar_lea.vmem %s832_s25, 128  ;;  %p900_p5 = scmp.ne.s32.totalorder %s889_s23, 0 }
  0x78   : > { %p555_p10 = scmp.ne.s32.totalorder %s832_s25, %s554_s26  ;;  %s629_s16 = smov [#allocation8]  }
  0x79   : > { %262 = vst [vmem:[%s256_s9] sm:$0xff] %v261_v4  ;;  %s558_s27 = sshll.u32 %s629_s16, 4  ;;  %s559_s27 = int_to_ptr.vmem [resolvable:$false] %s558_s27 }
  0x7a   : > { %p556_p7 = pnand %p555_p10, %p900_p5  ;;  %s560_s4 = scalar_lea.vmem %s559_s27, 256 }
  0x7b   : > { %p561_p6 = scmp.lt.s32.totalorder %s832_s25, %s559_s27  ;;  %p562_p12 = scmp.lt.s32.totalorder %s560_s4, %s554_s26 }
  0x7c   : > { %p557_p9 = pneg %p556_p7 }
  0x7d   : > { %p563_p0 = por %p562_p12, %p561_p6 }
  0x7f   : > { %p564_p8 = pnand %p563_p0, %p557_p9 }
  0x81   : > { %567 = shalt.err (!%p564_p8)
}
  0x82   : > { %s568_s7 = scalar_lea.hbm %s837_s22, 128  ;;  %s572_s1 = scalar_lea.hbm %s882_s3, 256 }
  0x83   : > { %p569_p13 = scmp.ne.s32.totalorder %s837_s22, %s568_s7  ;;  %p573_p3 = scmp.lt.u32.totalorder %s837_s22, %s882_s3 }
  0x84   : > { %p574_p4 = scmp.lt.u32.totalorder %s572_s1, %s568_s7  ;;  %p576_p10 = scmp.lt.u32.totalorder %s568_s7, %s837_s22 }
  0x85   : > { %p570_p11 = pnand %p569_p13, %p900_p5 }
  0x86   : > { %p575_p2 = por %p574_p4, %p573_p3 }
  0x87   : > { %p571_p1 = pneg %p570_p11 }
  0x88   : > { %p577_p7 = por %p576_p10, %p575_p2 }
  0x8a   : > { %p578_p9 = pnand %p577_p7, %p571_p1 }
  0x8c   : > { %581 = shalt.err (!%p578_p9)
}
  0x8d   : > { %414 = dma.vmem_to_hbm [thread:$0]  (%p900_p5), %s832_s25, 128, %s837_s22, %s264_s5  }
  0x8e PF: > { %s289_s8 = sand.u32 1, %s612_s12   ;;  %p901_p6 = scmp.ne.s32.totalorder %s890_s24, 0 }
  0x8f   : > { %p902_p12 = scmp.ge.s32.totalorder %s624_s15, 2  ;;  %s290_s20 = scalar_lea.sflag [#allocation4], %s289_s8 }
  0x91   : > { %p427_p0 = pnand %p902_p12, %p901_p6 }
  0x93   : > { %607 = dma.done.wait (!%p427_p0), %s290_s20, 128  }
  0x94   : > { %609 = vsyncadd (!%p427_p0), %s290_s20, 4294967168  ;;  %p19_p8 = scmp.ge.s32.totalorder %s675_s18, 4   ;;  %s903_s12 = smov %s616_s13 }
  0x95   : > { %s904_s13 = smov %s620_s14  ;;  %s905_s14 = smov %s687_s21 }
  0x96   : > { %s906_s15 = smov %s675_s18  ;;  %21 = sbr.rel (!%p19_p8) target bundleno = 9 (0x9), region = 101 }
  0x9d   :  { %295 = vsyncpa [#allocation3], 1 }
  0x9e   :  { %297 = vsyncpa [#allocation3 + $0x1], 1 }
  0x9f   :  { %298 = vsyncpa [#allocation6], 1 }
  0xa0   :  { %300 = vsyncpa [#allocation6 + $0x1], 1 }
  0xa1   :  { %301 = vsyncpa [#allocation4], 1 }
  0xa2   :  { %303 = vsyncpa [#allocation4 + $0x1], 1 }

</bundles_post_ra>
